<compile_context>
chip_gen: v7x
topology: tpu7x:2x2x1
jax: 0.10.0
libtpu: 0.0.40
codegen_flags: <defaults>
</compile_context>

<pallas_src>
import jax
import jax.numpy as jnp
from jax.experimental import pallas as pl
from jax.experimental.pallas import tpu as pltpu


# --------------------------------------------------------------------------- #
# Kernels
# --------------------------------------------------------------------------- #
def _matmul_bias_kernel(x_ref, w_ref, b_ref, o_ref):
    """o = x @ w + b  (rows of pixels x channels)."""
    acc = jnp.dot(x_ref[...], w_ref[...], preferred_element_type=jnp.float32)
    o_ref[...] = (acc + b_ref[...]).astype(o_ref.dtype)


def _fused_up_skip_kernel(x_ref, s_ref, wu_ref, ws_ref, b_ref, o_ref):
    """Fused SkipBlock tile:
       up  = x @ Wup          : ConvTranspose2d(k=2, s=2) of this pixel block
       sk  = s @ Wsk_blkdiag  : 1x1 conv of the matching 2x2 skip pixels
       out = up + sk + (b_up + b_skip)   written once, packed (a,b,co) columns
    """
    up = jnp.dot(x_ref[...], wu_ref[...], preferred_element_type=jnp.float32)
    sk = jnp.dot(s_ref[...], ws_ref[...], preferred_element_type=jnp.float32)
    o_ref[...] = (up + sk + b_ref[...]).astype(o_ref.dtype)


# --------------------------------------------------------------------------- #
# Launch helpers
# --------------------------------------------------------------------------- #
def _pick_row_tile(m, row_bytes, target=2048, vmem_budget=16 * 1024 * 1024):
    """Multiple-of-8 divisor of m: as large as possible but <= target and
    within a double-buffered VMEM budget, preferring >= 2 grid steps (v7x
    megacore).  A divisor means no input pad / output tail slice is needed."""
    if m % 8 != 0:
        return m                                   # single full block
    cap = min(target, max(8, vmem_budget // max(2 * row_bytes, 1)))
    divs = [t for t in range(8, m + 1, 8) if m % t == 0]
    good = [t for t in divs if t <= cap and m // t >= 2]
    if good:
        return max(good)
    ok = [t for t in divs if t <= cap]
    return max(ok) if ok else min(divs)


def _row_pallas(kernel, row_ins, rep_ins, out_cols):
    """Run `kernel` over row tiles of the 2-D row_ins; rep_ins (weights / bias
    rows) are replicated into every grid step."""
    m = row_ins[0].shape[0]
    row_bytes = 4 * (sum(a.shape[1] for a in row_ins) + out_cols)
    tr = _pick_row_tile(m, row_bytes)

    in_specs = [pl.BlockSpec((tr, a.shape[1]), lambda i: (i, 0)) for a in row_ins]
    in_specs += [pl.BlockSpec(a.shape, lambda i: (0, 0)) for a in rep_ins]

    return pl.pallas_call(
        kernel,
        out_shape=jax.ShapeDtypeStruct((m, out_cols), jnp.float32),
        grid_spec=pltpu.PrefetchScalarGridSpec(
            num_scalar_prefetch=0,
            grid=(m // tr,),
            in_specs=in_specs,
            out_specs=pl.BlockSpec((tr, out_cols), lambda i: (i, 0)),
        ),
        compiler_params=pltpu.CompilerParams(dimension_semantics=("parallel",)),
    )(*row_ins, *rep_ins)


# --------------------------------------------------------------------------- #
# Params + forward
# --------------------------------------------------------------------------- #
def init_skip_block_params(key, input_channels, skip_channels):
    k1, k2, k3, k4 = jax.random.split(key, 4)
    c, cs = input_channels, skip_channels
    up_scale = 1.0 / jnp.sqrt(c * 2 * 2)
    sk_scale = 1.0 / jnp.sqrt(cs * 1 * 1)
    return {
        # ConvTranspose2d weight layout (in, out, kH, kW); Conv2d (out, in, 1, 1)
        "up_w": jax.random.uniform(k1, (c, c, 2, 2), jnp.float32, -up_scale, up_scale),
        "up_b": jax.random.uniform(k2, (c,), jnp.float32, -up_scale, up_scale),
        "skip_w": jax.random.uniform(k3, (c, cs, 1, 1), jnp.float32, -sk_scale, sk_scale),
        "skip_b": jax.random.uniform(k4, (c,), jnp.float32, -sk_scale, sk_scale),
    }


def skip_block_forward(params, x_nchw, skip_nchw=None):
    n, c, h, w = x_nchw.shape

    # x as (pixels, C): channels on TPU lanes.
    x2d = jnp.transpose(x_nchw, (0, 2, 3, 1)).reshape(n * h * w, c)
    # ConvTranspose2d(C,C,k=2,s=2) == matmul with Wup[ci, (a,b,co)].
    wu = jnp.transpose(params["up_w"], (0, 2, 3, 1)).reshape(c, 4 * c)
    bu = jnp.tile(params["up_b"], 4)

    def unpack(out2d):
        # (n*h*w, (a,b,co)) -> NCHW (n, co, 2h, 2w): one XLA transpose pass.
        o6 = out2d.reshape(n, h, w, 2, 2, c)
        return jnp.transpose(o6, (0, 5, 1, 3, 2, 4)).reshape(n, c, 2 * h, 2 * w)

    if skip_nchw is None:
        return unpack(
            _row_pallas(_matmul_bias_kernel, [x2d], [wu, bu[None, :]], 4 * c)
        )

    cs, hs, ws_ = skip_nchw.shape[1], skip_nchw.shape[2], skip_nchw.shape[3]
    w1 = jnp.transpose(params["skip_w"][:, :, 0, 0], (1, 0))          # (Cs, C)

    if hs == 2 * h and ws_ == 2 * w:
        # ---- fused fast path: one kernel, 'up' never touches HBM ----
        # skip pixels regrouped as (n,i,j) rows x (a,b,ci) cols (one transpose,
        # same cost as the NCHW->NHWC layout change it replaces).
        s2d = jnp.transpose(
            skip_nchw.reshape(n, cs, h, 2, w, 2), (0, 2, 4, 3, 5, 1)
        ).reshape(n * h * w, 4 * cs)
        # 1x1 conv applied to each of the 4 (a,b) sub-pixels: block-diag weight.
        # TODO(synk): at very large C/Cs this 4x-sparse weight wastes MXU MACs;
        #             switch to a per-(a,b) dense matmul variant if MXU-bound.
        wsk = jnp.kron(jnp.eye(4, dtype=w1.dtype), w1)                # (4Cs, 4C)
        bias = (bu + jnp.tile(params["skip_b"], 4))[None, :]
        out2d = _row_pallas(
            _fused_up_skip_kernel, [x2d, s2d], [wu, wsk, bias], 4 * c
        )
        return unpack(out2d)

    # ---- mismatched spatial shapes: conv BEFORE pad (padded pixels are 0) ----
    # TODO(synk): mm.Pad's exact convention assumed = zero-pad smaller tensor
    #             on bottom/right up to the larger one.
    up = unpack(_row_pallas(_matmul_bias_kernel, [x2d], [wu, bu[None, :]], 4 * c))
    s_flat = jnp.transpose(skip_nchw, (0, 2, 3, 1)).reshape(n * hs * ws_, cs)
    sk2d = _row_pallas(
        _matmul_bias_kernel, [s_flat], [w1, params["skip_b"][None, :]], c
    )
    sk = jnp.transpose(sk2d.reshape(n, hs, ws_, c), (0, 3, 1, 2))
    ht, wt = max(2 * h, hs), max(2 * w, ws_)
    up = jnp.pad(up, ((0, 0), (0, 0), (0, ht - 2 * h), (0, wt - 2 * w)))
    sk = jnp.pad(sk, ((0, 0), (0, 0), (0, ht - hs), (0, wt - ws_)))
    return up + sk


# --------------------------------------------------------------------------- #
# Pure-JAX reference of the same PyTorch semantics (conv BEFORE pad)
# --------------------------------------------------------------------------- #
def _reference(params, x, skip=None):
    n, c, h, w = x.shape
    y6 = jnp.einsum("nchw,cdab->ndhawb", x, params["up_w"])
    up = y6.reshape(n, c, 2 * h, 2 * w) + params["up_b"][None, :, None, None]
    if skip is None:
        return up
    sk = jnp.einsum("nchw,dc->ndhw", skip, params["skip_w"][:, :, 0, 0])
    sk = sk + params["skip_b"][None, :, None, None]
    hs, ws_ = skip.shape[2], skip.shape[3]
    ht, wt = max(2 * h, hs), max(2 * w, ws_)
    up = jnp.pad(up, ((0, 0), (0, 0), (0, ht - 2 * h), (0, wt - 2 * w)))
    sk = jnp.pad(sk, ((0, 0), (0, 0), (0, ht - hs), (0, wt - ws_)))
    return up + sk


if __name__ == "__main__":
    key = jax.random.PRNGKey(0)
    kp, kx, ks = jax.random.split(key, 3)

    N, C, CS, H, W = 2, 8, 16, 8, 8           # input_channels=8, skip_channels=16
    params = init_skip_block_params(kp, C, CS)
    x = jax.random.normal(kx, (N, C, H, W), jnp.float32)
    skip = jax.random.normal(ks, (N, CS, 2 * H, 2 * W), jnp.float32)

    # fused fast path (shape-matched skip)
    out = jax.block_until_ready(skip_block_forward(params, x, skip))
    assert out.shape == (N, C, 2 * H, 2 * W), out.shape
    assert jnp.allclose(out, _reference(params, x, skip), atol=1e-4, rtol=1e-4)

    # upsample-only path (skip=None)
    out_up = jax.block_until_ready(skip_block_forward(params, x, None))
    assert jnp.allclose(out_up, _reference(params, x, None), atol=1e-4, rtol=1e-4)

    # mismatched-shape path: conv-before-pad (padded skip pixels contribute 0)
    skip_odd = jax.random.normal(ks, (N, CS, 2 * H - 2, 2 * W - 2), jnp.float32)
    out_mm = jax.block_until_ready(skip_block_forward(params, x, skip_odd))
    assert out_mm.shape == (N, C, 2 * H, 2 * W), out_mm.shape
    assert jnp.allclose(out_mm, _reference(params, x, skip_odd), atol=1e-4, rtol=1e-4)

    print("KERNEL_OK")
</pallas_src>

<mosaic_0001>
module attributes {stable_mosaic.version = 11 : i64} {
  func.func @_fused_up_skip_kernel(%arg0: i32, %arg1: memref<64x8xf32, #tpu.memory_space<vmem>>, %arg2: memref<64x64xf32, #tpu.memory_space<vmem>>, %arg3: memref<8x32xf32, #tpu.memory_space<vmem>>, %arg4: memref<64x32xf32, #tpu.memory_space<vmem>>, %arg5: memref<1x32xf32, #tpu.memory_space<vmem>>, %arg6: memref<64x32xf32, #tpu.memory_space<vmem>>) attributes {dimension_semantics = [#tpu.dimension_semantics<parallel>], iteration_bounds = array<i64: 2>, scalar_prefetch = 0 : i64, scratch_operands = 0 : i64, tpu.core_type = #tpu.core_type<tc>, window_params = [{transform_indices = @transform_0, window_bounds = array<i64: 64, 8>}, {transform_indices = @transform_1, window_bounds = array<i64: 64, 64>}, {pipeline_mode = #tpu.pipeline_mode<synchronous>, transform_indices = @transform_2, window_bounds = array<i64: 8, 32>}, {pipeline_mode = #tpu.pipeline_mode<synchronous>, transform_indices = @transform_3, window_bounds = array<i64: 64, 32>}, {pipeline_mode = #tpu.pipeline_mode<synchronous>, transform_indices = @transform_4, window_bounds = array<i64: 1, 32>}, {transform_indices = @transform_5, window_bounds = array<i64: 64, 32>}]} {
    %c0 = arith.constant 0 : index
    %c0_0 = arith.constant 0 : index
    %0 = vector.load %arg1[%c0, %c0_0] : memref<64x8xf32, #tpu.memory_space<vmem>>, vector<64x8xf32>
    %c0_1 = arith.constant 0 : index
    %c0_2 = arith.constant 0 : index
    %1 = vector.load %arg3[%c0_1, %c0_2] : memref<8x32xf32, #tpu.memory_space<vmem>>, vector<8x32xf32>
    %cst = arith.constant dense<0.000000e+00> : vector<64x32xf32>
    %2 = tpu.matmul %0, %1, %cst {dimension_numbers = #tpu.dot_dimension_numbers<[1], [0], [0], [1], [0, 0, 1, 1], [], []>} : vector<64x8xf32>, vector<8x32xf32>, vector<64x32xf32> -> vector<64x32xf32>
    %c0_3 = arith.constant 0 : index
    %c0_4 = arith.constant 0 : index
    %3 = vector.load %arg2[%c0_3, %c0_4] : memref<64x64xf32, #tpu.memory_space<vmem>>, vector<64x64xf32>
    %c0_5 = arith.constant 0 : index
    %c0_6 = arith.constant 0 : index
    %4 = vector.load %arg4[%c0_5, %c0_6] : memref<64x32xf32, #tpu.memory_space<vmem>>, vector<64x32xf32>
    %cst_7 = arith.constant dense<0.000000e+00> : vector<64x32xf32>
    %5 = tpu.matmul %3, %4, %cst_7 {dimension_numbers = #tpu.dot_dimension_numbers<[1], [0], [0], [1], [0, 0, 1, 1], [], []>} : vector<64x64xf32>, vector<64x32xf32>, vector<64x32xf32> -> vector<64x32xf32>
    %6 = arith.addf %2, %5 : vector<64x32xf32>
    %c0_8 = arith.constant 0 : index
    %c0_9 = arith.constant 0 : index
    %7 = vector.load %arg5[%c0_8, %c0_9] : memref<1x32xf32, #tpu.memory_space<vmem>>, vector<1x32xf32>
    %8 = vector.broadcast %7 : vector<1x32xf32> to vector<64x32xf32>
    %9 = arith.addf %6, %8 : vector<64x32xf32>
    %c0_10 = arith.constant 0 : index
    %c0_11 = arith.constant 0 : index
    %10 = vector.load %arg6[%c0_10, %c0_11] : memref<64x32xf32, #tpu.memory_space<vmem>>, vector<64x32xf32>
    tpu.vector_store %arg6[%c0_10, %c0_11], %9 {strides = array<i32>} : memref<64x32xf32, #tpu.memory_space<vmem>>, vector<64x32xf32>,
    return
  }
  func.func @transform_0(%arg0: i32) -> (i32, i32) {
    %c0_i32 = arith.constant 0 : i32
    %c0_i32_0 = arith.constant 0 : i32
    return %arg0, %c0_i32 : i32, i32
  }
  func.func @transform_1(%arg0: i32) -> (i32, i32) {
    %c0_i32 = arith.constant 0 : i32
    %c0_i32_0 = arith.constant 0 : i32
    return %arg0, %c0_i32 : i32, i32
  }
  func.func @transform_2(%arg0: i32) -> (i32, i32) {
    %c0_i32 = arith.constant 0 : i32
    %c0_i32_0 = arith.constant 0 : i32
    %c0_i32_1 = arith.constant 0 : i32
    return %c0_i32, %c0_i32_0 : i32, i32
  }
  func.func @transform_3(%arg0: i32) -> (i32, i32) {
    %c0_i32 = arith.constant 0 : i32
    %c0_i32_0 = arith.constant 0 : i32
    %c0_i32_1 = arith.constant 0 : i32
    return %c0_i32, %c0_i32_0 : i32, i32
  }
  func.func @transform_4(%arg0: i32) -> (i32, i32) {
    %c0_i32 = arith.constant 0 : i32
    %c0_i32_0 = arith.constant 0 : i32
    %c0_i32_1 = arith.constant 0 : i32
    return %c0_i32, %c0_i32_0 : i32, i32
  }
  func.func @transform_5(%arg0: i32) -> (i32, i32) {
    %c0_i32 = arith.constant 0 : i32
    %c0_i32_0 = arith.constant 0 : i32
    return %arg0, %c0_i32 : i32, i32
  }
}

</mosaic_0001>

<bundles_post_ra>
// kernel: tpu_custom_call.1
= control target key start
LH: loop header
LB: loop body
LE: loop exit
PB: predicated region body
PF: predicated region fallthrough
CT: control target
= control target key end

     0   :  { %s794_s18 = smov 0   ;;  %s893_s0 = inlined_call_operand.vmem [shape: f32[128,8], index: 0, kind: input, shape index: {}]   ;;  %s894_s1 = inlined_call_operand.vmem [shape: f32[128,64], index: 1, kind: input, shape index: {}]   ;;  %s895_s2 = inlined_call_operand.vmem [shape: f32[8,32], index: 2, kind: input, shape index: {}]   ;;  %s896_s3 = inlined_call_operand.vmem [shape: f32[64,32], index: 3, kind: input, shape index: {}]   ;;  %s897_s4 = inlined_call_operand.vmem [shape: f32[1,32], index: 4, kind: input, shape index: {}]   ;;  %s898_s5 = inlined_call_operand.vmem [shape: f32[128,32], index: 5, kind: output, shape index: {}]  }
   0x1 LB: > { %s627_s19 = sadd.s32 4294967295, %s762_s18   ;;  %p631_p0 = scmp.ge.s32.totalorder %s762_s18, 1  ;;  %s762_s18 = sphi %s794_s18, %s15_s18  }
   0x2   : > { %p199_p1 = scmp.lt.s32.totalorder %s762_s18, 3 }
   0x4   : > { %p200_p2 = pnand %p631_p0, %p199_p1 }
   0x5   : > { %v267_v0 = vld [vmem:[%s896_s3] sm:$0xff] (!%p200_p2)  ;;  %v268_v1 = vld [vmem:[%s896_s3 + $0x8] sm:$0xff] (!%p200_p2)  ;;  %v269_v2 = vld [vmem:[%s896_s3 + $0x10] sm:$0xff] (!%p200_p2)  ;;  %s632_s26 = sshll.u32 (!%p200_p2), %s627_s19, 3  ;;  %vm405_vm0 = vcmask (!%p200_p2), 64512   ;;  %vm275_vm1 = vcmask (!%p200_p2), 523264  }
   0x6   : > { %203 = sbr.rel (%p200_p2) target bundleno = 254 (0xfe), region = 40  ;;  %v724_v3 = vpack.c.bf16 (!%p200_p2), %v268_v1, %v267_v0  ;;  %v270_v4 = vld [vmem:[%s896_s3 + $0x18] sm:$0xff] (!%p200_p2)  ;;  %p233_p3 = scmp.lt.s32.totalorder (!%p200_p2), %s632_s26, 15  ;;  %v271_v6 = vld [vmem:[%s896_s3 + $0x20] sm:$0xff] (!%p200_p2)  ;;  %v272_v7 = vld [vmem:[%s896_s3 + $0x28] sm:$0xff] (!%p200_p2)  ;;  %vm550_vm2 = vcmask (!%p200_p2), 261120  }
   0x7   : > { %v728_v5 = vpack.c.bf16 (!%p200_p2), %v270_v4, %v269_v2  ;;  %v258_v8 = vld [vmem:[%s895_s2] sm:$0xff] (!%p200_p2)  ;;  %v732_v9 = vpack.c.bf16 (!%p200_p2), %v272_v7, %v271_v6  ;;  %v273_v10 = vld [vmem:[%s896_s3 + $0x30] sm:$0xff] (!%p200_p2)  ;;  %v274_v11 = vld [vmem:[%s896_s3 + $0x38] sm:$0xff] (!%p200_p2) }
   0x8   : > { %725 = vmatprep.subr.bf16.mxu1 (!%p200_p2), %v724_v3  ;;  %710 = vmatprep.subr.mxu0 (!%p200_p2), %v258_v8  ;;  %v736_v16 = vpack.c.bf16 (!%p200_p2), %v274_v11, %v273_v10  ;;  %v654_v35 = vld [vmem:[%s897_s4] ss:$0 sm:$0xff] (!%p200_p2) }
   0x9   : > { %727 = vmatpush3.bf16.msra.mxu1 (!%p200_p2), %v724_v3  ;;  %711 = vmatpush3.msra.mxu0 (!%p200_p2), %v258_v8 }
   0xa   : > { %729 = vmatprep.subr.bf16.mxu1 (!%p200_p2), %v728_v5 }
   0xd   : > { %s900_s26 = smov (!%p233_p3, %s632_s26), 15  ;;  %731 = vmatpush3.bf16.msra.mxu1 %v728_v5 }
   0xe   : > { %s823_s10 = sshll.u32 %s900_s26, 3  ;;  %733 = vmatprep.subr.bf16.mxu1 %v732_v9 }
   0xf   : > { %s236_s17 = scalar_lea.vmem %s893_s0, %s823_s10  ;;  %s839_s21 = scalar_lea.vmem %s894_s1, %s823_s10 }
  0x10   : > { %v250_v12 = vld [vmem:[%s236_s17] sm:$0xff]  ;;  %v251_v13 = vld [vmem:[%s236_s17 + $0x8] sm:$0xff]  ;;  %v252_v15 = vld [vmem:[%s236_s17 + $0x10] sm:$0xff]  ;;  %s872_s26 = scalar_lea.vmem %s898_s5, %s823_s10 }
  0x11   : > { %712 = vmatprep.mubr.msk.f32.mxu0 %vm405_vm0, %v250_v12  ;;  %v259_v14 = vld [vmem:[%s839_s21] sm:$0xff]  ;;  %v253_v17 = vld [vmem:[%s236_s17 + $0x18] sm:$0xff]  ;;  %735 = vmatpush3.bf16.msra.mxu1 %v732_v9  ;;  %v255_v19 = vld [vmem:[%s236_s17 + $0x28] sm:$0xff] }
  0x12   : > { %698 = vmatprep.mubr.msk.f32.mxu1 %vm275_vm1, %v259_v14  ;;  %713 = vmatmul.mubr.msk.f32.vlgmr.msra.gmra.mrb[0].mxu0 %vm405_vm0, %v251_v13  ;;  %v254_v18 = vld [vmem:[%s236_s17 + $0x20] sm:$0xff]  ;;  %v260_v20 = vld [vmem:[%s839_s21 + $0x8] sm:$0xff]  ;;  %v256_v21 = vld [vmem:[%s236_s17 + $0x30] sm:$0xff] }
  0x13   : > { %715 = vmatprep.mubr.msk.f32.mxu0 %vm405_vm0, %v252_v15  ;;  %737 = vmatprep.subr.bf16.mxu1 %v736_v16  ;;  %v261_v22 = vld [vmem:[%s839_s21 + $0x10] sm:$0xff]  ;;  %v257_v23 = vld [vmem:[%s236_s17 + $0x38] sm:$0xff]  ;;  %v263_v25 = vld [vmem:[%s839_s21 + $0x20] sm:$0xff] }
  0x14   : > { %v262_v24 = vld [vmem:[%s839_s21 + $0x18] sm:$0xff]  ;;  %v264_v26 = vld [vmem:[%s839_s21 + $0x28] sm:$0xff]  ;;  %v265_v27 = vld [vmem:[%s839_s21 + $0x30] sm:$0xff] }
  0x15   : > { %739 = vmatpush3.bf16.msra.mxu1 %v736_v16  ;;  %v266_v28 = vld [vmem:[%s839_s21 + $0x38] sm:$0xff] }
  0x16   : > { %716 = vmatmul.mubr.msk.f32.gmra.mrb[2].mxu0 %vm405_vm0, %v253_v17 }
  0x17   : > { %718 = vmatprep.mubr.msk.f32.mxu0 %vm405_vm0, %v254_v18 }
  0x18   : > { %699 = vmatmul.mubr.msk.f32.vlgmr.msra.gmra.mrb[0].mxu1 %vm275_vm1, %v260_v20 }
  0x19   : > { %701 = vmatprep.mubr.msk.f32.mxu1 %vm275_vm1, %v261_v22 }
  0x1a   : > { %719 = vmatmul.mubr.msk.f32.gmra.mrb[4].mxu0 %vm405_vm0, %v255_v19 }
  0x1b   : > { %721 = vmatprep.mubr.msk.f32.mxu0 %vm405_vm0, %v256_v21 }
  0x1c   : > { %702 = vmatmul.mubr.msk.f32.gmra.mrb[2].mxu1 %vm275_vm1, %v262_v24 }
  0x1d   : > { %704 = vmatprep.mubr.msk.f32.mxu1 %vm275_vm1, %v263_v25 }
  0x1e   : > { %722 = vmatmul.mubr.msk.f32.gmra.mrb[6].mxu0 %vm405_vm0, %v257_v23 }
  0x20   : > { %705 = vmatmul.mubr.msk.f32.gmra.mrb[4].mxu1 %vm275_vm1, %v264_v26 }
  0x21   : > { %707 = vmatprep.mubr.msk.f32.mxu1 %vm275_vm1, %v265_v27 }
  0x24   : > { %708 = vmatmul.mubr.msk.f32.gmra.mrb[6].mxu1 %vm275_vm1, %v266_v28 }
  0xe5   : > { %v714_v29 = vpop.f32.mrb[0].mxu0 }
  0xe6   : > { %v496_v30 = vpop.f32.mrb[1].mxu0 }
  0xe9   : > { %v717_v31 = vpop.f32.mrb[2].mxu0 }
  0xea   : > { %v506_v32 = vpop.f32.mrb[3].mxu0 }
  0xeb   : > { %v700_v34 = vpop.f32.mrb[0].mxu1 }
  0xec   : > { %v502_v37 = vadd.f32 %v714_v29, %v700_v34  ;;  %v366_v38 = vpop.f32.mrb[1].mxu1 }
  0xed   : > { %v720_v33 = vpop.f32.mrb[4].mxu0  ;;  %v497_v39 = vadd.f32 %v496_v30, %v366_v38 }
  0xee   : > { %v516_v36 = vpop.f32.mrb[5].mxu0  ;;  %v543_v40 = vadd.f32 %v654_v35, %v502_v37 }
  0xef   : > { %v542_v42 = vadd.f32 %v654_v35, %v497_v39  ;;  %v703_v43 = vpop.f32.mrb[2].mxu1 }
  0xf0   : > { %552 = vst.msk [vmem:[%s872_s26 + $0x8] sm:$0xff] %vm550_vm2, %v543_v40  ;;  %v512_v45 = vadd.f32 %v717_v31, %v703_v43  ;;  %v376_v46 = vpop.f32.mrb[3].mxu1 }
  0xf1   : > { %v723_v41 = vpop.f32.mrb[6].mxu0  ;;  %551 = vst.msk [vmem:[%s872_s26] sm:$0xff] %vm550_vm2, %v542_v42  ;;  %v507_v47 = vadd.f32 %v506_v32, %v376_v46 }
  0xf2   : > { %v526_v44 = vpop.f32.mrb[7].mxu0  ;;  %v545_v48 = vadd.f32 %v654_v35, %v512_v45 }
  0xf3   : > { %v544_v49 = vadd.f32 %v654_v35, %v507_v47  ;;  %v706_v50 = vpop.f32.mrb[4].mxu1 }
  0xf4   : > { %554 = vst.msk [vmem:[%s872_s26 + $0x18] sm:$0xff] %vm550_vm2, %v545_v48  ;;  %v522_v51 = vadd.f32 %v720_v33, %v706_v50  ;;  %v386_v52 = vpop.f32.mrb[5].mxu1 }
  0xf5   : > { %553 = vst.msk [vmem:[%s872_s26 + $0x10] sm:$0xff] %vm550_vm2, %v544_v49  ;;  %v517_v53 = vadd.f32 %v516_v36, %v386_v52 }
  0xf6   : > { %v547_v54 = vadd.f32 %v654_v35, %v522_v51 }
  0xf7   : > { %v546_v55 = vadd.f32 %v654_v35, %v517_v53  ;;  %v709_v56 = vpop.f32.mrb[6].mxu1 }
  0xf8   : > { %556 = vst.msk [vmem:[%s872_s26 + $0x28] sm:$0xff] %vm550_vm2, %v547_v54  ;;  %v532_v57 = vadd.f32 %v723_v41, %v709_v56  ;;  %v396_v58 = vpop.f32.mrb[7].mxu1 }
  0xf9   : > { %555 = vst.msk [vmem:[%s872_s26 + $0x20] sm:$0xff] %vm550_vm2, %v546_v55  ;;  %v527_v59 = vadd.f32 %v526_v44, %v396_v58 }
  0xfa   : > { %v549_v60 = vadd.f32 %v654_v35, %v532_v57 }
  0xfb   : > { %v548_v61 = vadd.f32 %v654_v35, %v527_v59 }
  0xfc   : > { %558 = vst.msk [vmem:[%s872_s26 + $0x38] sm:$0xff] %vm550_vm2, %v549_v60 }
  0xfd   : > { %557 = vst.msk [vmem:[%s872_s26 + $0x30] sm:$0xff] %vm550_vm2, %v548_v61 }
  0xfe PF: > { %s15_s18 = sadd.s32 1, %s762_s18  }
  0xff   : > { %p12_p4 = scmp.ge.s32.totalorder %s15_s18, 4  }
 0x101   :  { %14 = sbr.rel (!%p12_p4) target bundleno = 1 (0x1), region = 73 }

</bundles_post_ra>
